<compile_context>
chip_gen: v5e
topology: v5e:2x2
jax: 0.10.0
libtpu: 0.0.40
codegen_flags: <defaults>
</compile_context>

<pallas_src>
import jax
import jax.numpy as jnp
from jax import lax
from jax.experimental import pallas as pl
from jax.experimental.pallas import tpu as pltpu

_VMEM_LIMIT = 32 * 1024 * 1024          # explicit scoped-VMEM limit (covers v5e's 16 MiB default)
_VMEM_BUDGET = 24 * 1024 * 1024         # tile-plan budget (double-buffered), safe on v7x too


def _round_up(x, m):
    return ((x + m - 1) // m) * m


# --------------------------- Mode A: full-K strips ---------------------------
def _permute_matmul_fullk_kernel(x1_ref, x2_ref, o_ref):
    # x1_ref: (K, tm) strip of x1[b]  (K-major == already the "permuted" view)
    # x2_ref: (K, tn) strip of x2[b]
    # o_ref : (tm, tn) output tile
    o_ref[...] = lax.dot_general(
        x1_ref[...], x2_ref[...],
        dimension_numbers=(((0,), (0,)), ((), ())),
        preferred_element_type=jnp.float32,
    ).astype(o_ref.dtype)


# ------------------------ Mode B: K-tiled accumulator ------------------------
def _permute_matmul_ktiled_kernel(x1_ref, x2_ref, o_ref, acc_ref):
    # x1_ref: (tk, tm), x2_ref: (tk, tn), o_ref/acc_ref: (tm, tn)
    k = pl.program_id(3)

    @pl.when(k == 0)
    def _():
        acc_ref[...] = jnp.zeros_like(acc_ref)

    acc_ref[...] += lax.dot_general(
        x1_ref[...], x2_ref[...],
        dimension_numbers=(((0,), (0,)), ((), ())),
        preferred_element_type=jnp.float32,
    )

    # Only materialize the output on the last K step (saves a (tm,tn) read +
    # cast + store on every other iteration).
    @pl.when(k == pl.num_programs(3) - 1)
    def _():
        o_ref[...] = acc_ref[...].astype(o_ref.dtype)


def permute_matmul(x1, x2, *, tm_max=512, tn_max=512, tk_max=512,
                   force_k_tiled=False):
    """x1: (B, K, M), x2: (B, K, N) -> (B, M, N) == matmul(x1.permute(0,2,1), x2)."""
    B, K, M = x1.shape
    B2, K2, N = x2.shape
    assert B == B2 and K == K2, "shape mismatch"

    out_dtype = jnp.result_type(x1.dtype, x2.dtype)
    in_bytes = jnp.dtype(x1.dtype).itemsize
    out_bytes = jnp.dtype(out_dtype).itemsize

    # Lane-aligned caps (last dims must be multiples of 128 unless full-extent).
    tm_cap = min(tm_max, _round_up(M, 128))
    tn_cap = min(tn_max, _round_up(N, 128))

    # ---------------- Mode A: pick the largest tiles whose full-K strips fit.
    def footprint_a(tm, tn):
        # double-buffered x1/x2 strips + double-buffered output tile
        return 2 * K * (tm + tn) * in_bytes + 2 * tm * tn * out_bytes

    tm = tn = None
    if not force_k_tiled:
        for cand_tm, cand_tn in ((512, 512), (512, 256), (256, 256),
                                 (256, 128), (128, 128)):
            cm, cn = min(cand_tm, tm_cap), min(cand_tn, tn_cap)
            if footprint_a(cm, cn) <= _VMEM_BUDGET:
                tm, tn = cm, cn
                break

    if tm is not None:
        mb, nb = pl.cdiv(M, tm), pl.cdiv(N, tn)
        grid = (B, mb, nb)
        # x1 DMA'd once per (b, i); x2 once per (b, i, j); output written once.
        bytes_accessed = (in_bytes * B * K * (M + mb * N)
                          + out_bytes * B * M * N)
        return pl.pallas_call(
            _permute_matmul_fullk_kernel,
            out_shape=jax.ShapeDtypeStruct((B, M, N), out_dtype),
            grid_spec=pltpu.PrefetchScalarGridSpec(
                num_scalar_prefetch=0,
                grid=grid,
                in_specs=[
                    # LHS-stationary: block index independent of j -> strip
                    # stays resident in VMEM across the whole N sweep.
                    pl.BlockSpec((pl.Squeezed(), K, tm), lambda b, i, j: (b, 0, i)),
                    pl.BlockSpec((pl.Squeezed(), K, tn), lambda b, i, j: (b, 0, j)),
                ],
                out_specs=pl.BlockSpec((pl.Squeezed(), tm, tn),
                                       lambda b, i, j: (b, i, j)),
            ),
            compiler_params=pltpu.CompilerParams(
                dimension_semantics=("parallel", "parallel", "parallel"),
                vmem_limit_bytes=_VMEM_LIMIT,
            ),
            cost_estimate=pl.CostEstimate(
                flops=2 * B * M * N * K,
                transcendentals=0,
                bytes_accessed=bytes_accessed,
            ),
        )(x1, x2)

    # ---------------- Mode B: K too large for resident strips -> tile K.
    tm = min(256, tm_cap)
    tn = min(256, tn_cap)
    tk = min(tk_max, _round_up(K, 8))

    # Only the K tail must be zero (it feeds valid outputs); M/N ragged edge
    # blocks are handled by Pallas and never land in the (B, M, N) output.
    K_pad = _round_up(K, tk)
    if K_pad != K:
        x1 = jnp.pad(x1, ((0, 0), (0, K_pad - K), (0, 0)))
        x2 = jnp.pad(x2, ((0, 0), (0, K_pad - K), (0, 0)))

    mb, nb = pl.cdiv(M, tm), pl.cdiv(N, tn)
    grid = (B, mb, nb, K_pad // tk)
    bytes_accessed = (in_bytes * B * K_pad * (nb * M + mb * N)
                      + out_bytes * B * M * N)

    return pl.pallas_call(
        _permute_matmul_ktiled_kernel,
        out_shape=jax.ShapeDtypeStruct((B, M, N), out_dtype),
        grid_spec=pltpu.PrefetchScalarGridSpec(
            num_scalar_prefetch=0,
            grid=grid,
            in_specs=[
                pl.BlockSpec((pl.Squeezed(), tk, tm), lambda b, i, j, k: (b, k, i)),
                pl.BlockSpec((pl.Squeezed(), tk, tn), lambda b, i, j, k: (b, k, j)),
            ],
            out_specs=pl.BlockSpec((pl.Squeezed(), tm, tn),
                                   lambda b, i, j, k: (b, i, j)),
            scratch_shapes=[pltpu.VMEM((tm, tn), jnp.float32)],
        ),
        compiler_params=pltpu.CompilerParams(
            dimension_semantics=("parallel", "parallel", "parallel", "arbitrary"),
            vmem_limit_bytes=_VMEM_LIMIT,
        ),
        cost_estimate=pl.CostEstimate(
            flops=2 * B * M * N * K_pad,
            transcendentals=0,
            bytes_accessed=bytes_accessed,
        ),
    )(x1, x2)


if __name__ == "__main__":
    key = jax.random.PRNGKey(0)
    k1, k2, k3, k4 = jax.random.split(key, 4)

    # --- small test, shapes consistent with the module semantics ------------
    # x1: (B, K, M), x2: (B, K, N) -> matmul(x1.permute(0,2,1), x2): (B, M, N)
    B, K, M, N = 2, 32, 16, 8
    x1 = jax.random.normal(k1, (B, K, M), dtype=jnp.float32)
    x2 = jax.random.normal(k2, (B, K, N), dtype=jnp.float32)

    out = jax.block_until_ready(permute_matmul(x1, x2))
    ref = jnp.matmul(jnp.transpose(x1, (0, 2, 1)), x2,
                     precision=lax.Precision.HIGHEST)
    assert out.shape == (B, M, N)
    assert jnp.allclose(out, ref, atol=1e-3, rtol=1e-3)

    # --- ragged / multi-block test (partial M and N edge blocks, no padding) -
    B2_, K2_, M2_, N2_ = 2, 160, 200, 150
    y1 = jax.random.normal(k3, (B2_, K2_, M2_), dtype=jnp.float32)
    y2 = jax.random.normal(k4, (B2_, K2_, N2_), dtype=jnp.float32)

    out2 = jax.block_until_ready(permute_matmul(y1, y2, tm_max=128, tn_max=128))
    ref2 = jnp.matmul(jnp.transpose(y1, (0, 2, 1)), y2,
                      precision=lax.Precision.HIGHEST)
    assert out2.shape == (B2_, M2_, N2_)
    assert jnp.allclose(out2, ref2, atol=1e-3, rtol=1e-3)

    # --- force the K-tiled accumulator fallback (used when K strips > VMEM) --
    out3 = jax.block_until_ready(
        permute_matmul(y1, y2, force_k_tiled=True, tk_max=64))
    assert jnp.allclose(out3, ref2, atol=1e-3, rtol=1e-3)

    print("KERNEL_OK")
</pallas_src>

<mosaic_0001>
module attributes {stable_mosaic.version = 11 : i64} {
  func.func @_permute_matmul_fullk_kernel(%arg0: i32, %arg1: i32, %arg2: i32, %arg3: memref<1x32x128xf32, #tpu.memory_space<vmem>>, %arg4: memref<1x32x128xf32, #tpu.memory_space<vmem>>, %arg5: memref<1x128x128xf32, #tpu.memory_space<vmem>>) attributes {dimension_semantics = [#tpu.dimension_semantics<parallel>, #tpu.dimension_semantics<parallel>, #tpu.dimension_semantics<parallel>], iteration_bounds = array<i64: 2, 1, 1>, scalar_prefetch = 0 : i64, scratch_operands = 0 : i64, tpu.core_type = #tpu.core_type<tc>, window_params = [{transform_indices = @transform_0, window_bounds = array<i64: 1, 32, 128>}, {transform_indices = @transform_1, window_bounds = array<i64: 1, 32, 128>}, {transform_indices = @transform_2, window_bounds = array<i64: 1, 128, 128>}]} {
    %c0 = arith.constant 0 : index
    %c0_0 = arith.constant 0 : index
    %c0_1 = arith.constant 0 : index
    %0 = vector.load %arg3[%c0, %c0_0, %c0_1] : memref<1x32x128xf32, #tpu.memory_space<vmem>>, vector<1x32x128xf32>
    %1 = vector.shape_cast %0 : vector<1x32x128xf32> to vector<32x128xf32>
    %c0_2 = arith.constant 0 : index
    %c0_3 = arith.constant 0 : index
    %c0_4 = arith.constant 0 : index
    %2 = vector.load %arg4[%c0_2, %c0_3, %c0_4] : memref<1x32x128xf32, #tpu.memory_space<vmem>>, vector<1x32x128xf32>
    %3 = vector.shape_cast %2 : vector<1x32x128xf32> to vector<32x128xf32>
    %cst = arith.constant dense<0.000000e+00> : vector<128x128xf32>
    %4 = tpu.matmul %1, %3, %cst {dimension_numbers = #tpu.dot_dimension_numbers<[0], [0], [1], [1], [0, 1, 1, 1], [], []>} : vector<32x128xf32>, vector<32x128xf32>, vector<128x128xf32> -> vector<128x128xf32>
    %c0_5 = arith.constant 0 : index
    %c0_6 = arith.constant 0 : index
    %c0_7 = arith.constant 0 : index
    %5 = vector.load %arg5[%c0_5, %c0_6, %c0_7] : memref<1x128x128xf32, #tpu.memory_space<vmem>>, vector<1x128x128xf32>
    %6 = vector.shape_cast %5 : vector<1x128x128xf32> to vector<128x128xf32>
    %7 = vector.shape_cast %4 : vector<128x128xf32> to vector<1x128x128xf32>
    tpu.vector_store %arg5[%c0_5, %c0_6, %c0_7], %7 {strides = array<i32>} : memref<1x128x128xf32, #tpu.memory_space<vmem>>, vector<1x128x128xf32>,
    return
  }
  func.func @transform_0(%arg0: i32, %arg1: i32, %arg2: i32) -> (i32, i32, i32) {
    %c0_i32 = arith.constant 0 : i32
    %c0_i32_0 = arith.constant 0 : i32
    return %arg0, %c0_i32, %arg1 : i32, i32, i32
  }
  func.func @transform_1(%arg0: i32, %arg1: i32, %arg2: i32) -> (i32, i32, i32) {
    %c0_i32 = arith.constant 0 : i32
    %c0_i32_0 = arith.constant 0 : i32
    return %arg0, %c0_i32, %arg2 : i32, i32, i32
  }
  func.func @transform_2(%arg0: i32, %arg1: i32, %arg2: i32) -> (i32, i32, i32) {
    %c0_i32 = arith.constant 0 : i32
    return %arg0, %arg1, %arg2 : i32, i32, i32
  }
}

</mosaic_0001>

<bundles_post_ra>
// kernel: tpu_custom_call.1
= control target key start
LH: loop header
LB: loop body
LE: loop exit
PB: predicated region body
PF: predicated region fallthrough
CT: control target
= control target key end

     0   :  { %s838_s9 = smov 0   ;;  %s840_s10 = smov 0   ;;  %s933_s0 = inlined_call_operand.vmem [shape: f32[2,32,16], index: 0, kind: input, shape index: {}]   ;;  %s934_s1 = inlined_call_operand.vmem [shape: f32[2,32,8], index: 1, kind: input, shape index: {}]   ;;  %s935_s2 = inlined_call_operand.vmem [shape: f32[2,16,8], index: 2, kind: output, shape index: {}]  }
   0x1   :  { %s842_s11 = smov 0   ;;  %s844_s12 = smov 0  }
   0x2   :  { %s846_s13 = smov 0  }
   0x3 LB: > { %s636_s14 = sadd.s32 4294967295, %s817_s13   ;;  %s31_s15 = sadd.s32 1, %s813_s12  ;;  %s817_s13 = sphi %s846_s13, %s12_s13   ;;  %s813_s12 = sphi %s844_s12, %s940_s12   ;;  %s809_s11 = sphi %s842_s11, %s939_s11   ;;  %s805_s10 = sphi %s840_s10, %s938_s10   ;;  %s801_s9 = sphi %s838_s9, %s937_s9  }
   0x4   : > { %p33_p0 = scmp.ge.s32.totalorder %s31_s15, 2  ;;  %s98_s16 = sadd.s32 1, %s805_s10 }
   0x5   : > { %p108_p1 = scmp.ne.s32.totalorder %s805_s10, %s801_s9  ;;  %p109_p2 = scmp.eq.s32.totalorder %s636_s14, 1 }
   0x6   : > { %s942_s15 = smov (%p33_p0, %s31_s15), 0  ;;  %p640_p4 = scmp.ge.s32.totalorder %s817_s13, 1 }
   0x7   : > { %p870_p3 = por %p109_p2, %p108_p1  ;;  %s91_s18 = ssub.s32 %s813_s12, %s942_s15 }
   0x8   : > { %p155_p5 = scmp.lt.s32.totalorder %s817_s13, 3  ;;  %p96_p6 = scmp.eq.s32.totalorder %s91_s18, 0 }
   0xa   : > { %p156_p7 = pnand %p640_p4, %p155_p5 }
   0xb   : > { %s879_s19 = scalar_select %p96_p6, %s805_s10, %s98_s16  }
   0xc   : > { %159 = sbr.rel (%p156_p7) target bundleno = 447 (0x1bf), region = 28  ;;  %p187_p8 = scmp.lt.s32.totalorder (!%p156_p7), %s809_s11, 1 }
   0xd   : > { %s184_s28 = sand.u32 (!%p156_p7), 1, %s801_s9  }
   0xe   : > { %s641_s29 = sshll.u32 (!%p156_p7), %s184_s28, 7 }
   0xf   : > { %s906_s30 = scalar_lea.vmem (!%p156_p7), [#allocation2], %s641_s29  }
  0x11   : > { %s188_s20 = scalar_select %p187_p8, %s809_s11, 1  ;;  %vm246_vm0 = vcmask 261120  }
  0x12   : > { %s677_s3 = sshll.u32 (%p870_p3), %s809_s11, 4  ;;  %s819_s7 = smov (%p870_p3), 0  }
  0x13   : > { %s675_s21 = sshll.u32 %s188_s20, 5  ;;  %s391_s6 = scalar_lea.vmem (%p870_p3), %s935_s2, %s677_s3  }
  0x14   : > { %s194_s24 = scalar_lea.vmem %s933_s0, %s675_s21  ;;  %s202_s27 = scalar_lea.vmem %s934_s1, %s675_s21 }
  0x15   : > { %v206_v0 = vld [vmem:[%s194_s24] sm:$0xff]  ;;  %v213_v1 = vld [vmem:[%s202_s27 + $0x18] sm:$0xff]  ;;  %v212_v2 = vld [vmem:[%s202_s27 + $0x10] sm:$0xff] }
  0x16   : > { %214 = vxpose.xlu0.b32.start [1/4] (short) %v206_v0, 128  ;;  %307 = vmatpush.msra.mxu0 %v213_v1  ;;  %v211_v3 = vld [vmem:[%s202_s27 + $0x8] sm:$0xff]  ;;  %v210_v4 = vld [vmem:[%s202_s27] sm:$0xff]  ;;  %v208_v6 = vld [vmem:[%s194_s24 + $0x10] sm:$0xff] }
  0x17   : > { %678 = vmatpush.msra.mxu1 %v213_v1  ;;  %679 = vmatpush.msra.mxu2 %v213_v1  ;;  %v207_v5 = vld [vmem:[%s194_s24 + $0x8] sm:$0xff]  ;;  %v209_v7 = vld [vmem:[%s194_s24 + $0x18] sm:$0xff] }
  0x18   : > { %680 = vmatpush.msra.mxu3 %v213_v1  ;;  %308 = vmatpush.msra.mxu0 %v212_v2 }
  0x19   : > { %681 = vmatpush.msra.mxu1 %v212_v2  ;;  %682 = vmatpush.msra.mxu2 %v212_v2 }
  0x1a   : > { %683 = vmatpush.msra.mxu3 %v212_v2  ;;  %309 = vmatpush.msra.mxu0 %v211_v3 }
  0x1b   : > { %684 = vmatpush.msra.mxu1 %v211_v3  ;;  %685 = vmatpush.msra.mxu2 %v211_v3 }
  0x1c   : > { %686 = vmatpush.msra.mxu3 %v211_v3  ;;  %310 = vmatpush.msra.mxu0 %v210_v4 }
  0x1d   : > { %687 = vmatpush.msra.mxu1 %v210_v4  ;;  %688 = vmatpush.msra.mxu2 %v210_v4 }
  0x1e   : > { %215 = vxpose.xlu0.b32.cont [2/4] (short) %v207_v5, 128  ;;  %689 = vmatpush.msra.mxu3 %v210_v4 }
  0x26   : > { %216 = vxpose.xlu0.b32.cont [3/4] (short) %v208_v6, 128 }
  0x2e   : > { %217 = vxpose.xlu0.b32.end [4/4] (short) %v209_v7, 128 }
  0xba   : > { %v230_v8 = vpop.trf.xlu0 }
  0xbb   : > { %646 = vmatmul.msk.f32.vlgmr.msra.gmra.mxu0 %vm246_vm0, %v230_v8 }
  0xc2   : > { %v231_v9 = vpop.trf.xlu0 }
  0xc3   : > { %647 = vmatmul.msk.f32.gmra.mxu0 %vm246_vm0, %v231_v9 }
  0xca   : > { %v232_v10 = vpop.trf.xlu0 }
  0xcb   : > { %648 = vmatmul.msk.f32.gmra.mxu0 %vm246_vm0, %v232_v10 }
  0xd2   : > { %v233_v11 = vpop.trf.xlu0 }
  0xd3   : > { %649 = vmatmul.msk.f32.gmra.mxu0 %vm246_vm0, %v233_v11 }
  0xda   : > { %v234_v12 = vpop.trf.xlu0 }
  0xdb   : > { %650 = vmatmul.msk.f32.vlgmr.msra.gmra.mxu1 %vm246_vm0, %v234_v12 }
  0xe2   : > { %v235_v13 = vpop.trf.xlu0 }
  0xe3   : > { %651 = vmatmul.msk.f32.gmra.mxu1 %vm246_vm0, %v235_v13 }
  0xea   : > { %v236_v14 = vpop.trf.xlu0 }
  0xeb   : > { %652 = vmatmul.msk.f32.gmra.mxu1 %vm246_vm0, %v236_v14 }
  0xf2   : > { %v237_v15 = vpop.trf.xlu0 }
  0xf3   : > { %653 = vmatmul.msk.f32.gmra.mxu1 %vm246_vm0, %v237_v15 }
  0xfa   : > { %v238_v16 = vpop.trf.xlu0 }
  0xfb   : > { %654 = vmatmul.msk.f32.vlgmr.msra.gmra.mxu2 %vm246_vm0, %v238_v16 }
 0x102   : > { %v239_v17 = vpop.trf.xlu0 }
 0x103   : > { %655 = vmatmul.msk.f32.gmra.mxu2 %vm246_vm0, %v239_v17 }
 0x10a   : > { %v240_v18 = vpop.trf.xlu0 }
 0x10b   : > { %656 = vmatmul.msk.f32.gmra.mxu2 %vm246_vm0, %v240_v18 }
 0x112   : > { %v241_v19 = vpop.trf.xlu0 }
 0x113   : > { %657 = vmatmul.msk.f32.gmra.mxu2 %vm246_vm0, %v241_v19 }
 0x11a   : > { %v242_v20 = vpop.trf.xlu0 }
 0x11b   : > { %658 = vmatmul.msk.f32.vlgmr.msra.gmra.mxu3 %vm246_vm0, %v242_v20 }
 0x122   : > { %v243_v21 = vpop.trf.xlu0 }
 0x123   : > { %659 = vmatmul.msk.f32.gmra.mxu3 %vm246_vm0, %v243_v21 }
 0x12a   : > { %v244_v22 = vpop.trf.xlu0 }
 0x12b   : > { %660 = vmatmul.msk.f32.gmra.mxu3 %vm246_vm0, %v244_v22 }
 0x132   : > { %v245_v23 = vpop.trf.xlu0 }
 0x133   : > { %661 = vmatmul.msk.f32.gmra.mxu3 %vm246_vm0, %v245_v23 }
 0x138   : > { %v312_v24 = vpop.f32.mrf.mxu0 }
 0x139   : > { %360 = vst [vmem:[%s906_s30] sm:$0xff] %v312_v24 }
 0x140   : > { %v315_v25 = vpop.f32.mrf.mxu0 }
 0x141   : > { %361 = vst [vmem:[%s906_s30 + $0x8] sm:$0xff] %v315_v25 }
 0x148   : > { %v318_v26 = vpop.f32.mrf.mxu0 }
 0x150   : > { %v321_v27 = vpop.f32.mrf.mxu0 }
 0x158   : > { %v324_v28 = vpop.f32.mrf.mxu1 }
 0x160   : > { %v327_v29 = vpop.f32.mrf.mxu1 }
 0x168   : > { %v330_v30 = vpop.f32.mrf.mxu1 }
 0x170   : > { %v333_v31 = vpop.f32.mrf.mxu1 }
 0x17e   : > { %v336_v32 = vpop.f32.mrf.mxu2 }
 0x186   : > { %v339_v33 = vpop.f32.mrf.mxu2 }
 0x18e   : > { %v342_v34 = vpop.f32.mrf.mxu2 }
 0x196   : > { %v345_v35 = vpop.f32.mrf.mxu2 }
 0x19e   : > { %v348_v36 = vpop.f32.mrf.mxu3 }
 0x1a6   : > { %v351_v37 = vpop.f32.mrf.mxu3 }
 0x1ae   : > { %v354_v38 = vpop.f32.mrf.mxu3 }
 0x1b2   : > { %382 = sbr.rel (!%p870_p3) target bundleno = 447 (0x1bf), region = 32 }
 0x1b6   : > { %v357_v39 = vpop.f32.mrf.mxu3 }
 0x1b7 LB: >> { %v459_v40 = vld [vmem:[%s906_s30] sm:$0xff]  ;;  %v461_v41 = vld [vmem:[%s906_s30 + $0x8] sm:$0xff]  ;;  %s453_s7 = sadd.s32 1, %s821_s7   ;;  %s821_s7 = sphi %s819_s7, %s453_s7  }
 0x1b8   : >> { %460 = vst [vmem:[%s391_s6] sm:$0xff] %v459_v40  ;;  %p452_p9 = scmp.ge.s32.totalorder %s453_s7, 1 }
 0x1b9   : >> { %462 = vst [vmem:[%s391_s6 + $0x8] sm:$0xff] %v461_v41 }
 0x1ba   : > { %455 = sbr.rel (!%p452_p9) target bundleno = 439 (0x1b7), region = 121 }
 0x1bf PF: > { %s12_s13 = sadd.s32 1, %s817_s13   ;;  %s937_s9 = smov %s805_s10 }
 0x1c0   : > { %p9_p10 = scmp.ge.s32.totalorder %s12_s13, 4   ;;  %s938_s10 = smov %s879_s19 }
 0x1c1   : > { %s939_s11 = smov %s813_s12  ;;  %s940_s12 = smov %s942_s15 }
 0x1c2   :  { %11 = sbr.rel (!%p9_p10) target bundleno = 3 (0x3), region = 143 }

</bundles_post_ra>
